<compile_context>
chip_gen: v5e
topology: v5e:2x2
jax: 0.10.0
libtpu: 0.0.40
codegen_flags: <defaults>
</compile_context>

<pallas_src>
import jax
import jax.numpy as jnp
from jax import lax
from jax.experimental import pallas as pl
from jax.experimental.pallas import tpu as pltpu
import numpy as np

EPS = 1e-5


def _aff_kernel(bias_ref, x_ref, r_ref, w_ref, o_ref):
    # bias_ref: SMEM f32[1] -- fused (BN-folded) local+global bias.
    # x_ref, r_ref, o_ref: VMEM (N, C, HW_pad), native dtype.
    # w_ref: VMEM f32 (2, C) -- row 0 = BN-folded local 1x1-conv weight,
    #                          row 1 = BN-folded global weight * (1/HW).
    n_batch = x_ref.shape[0]
    w2 = w_ref[...]                                  # (2, C) f32
    bias = bias_ref[0]

    # N is tiny (2); static unroll keeps everything 2-D and lane-dense.
    for n in range(n_batch):
        x = x_ref[n].astype(jnp.float32)             # (C, HW)
        d = r_ref[n].astype(jnp.float32) - x         # reused for |d| and fuse
        xa = jnp.abs(d)

        # Both 1x1 convs in a single MXU push: (2, C) @ (C, HW) -> (2, HW).
        # Explicit HIGHEST precision: true-f32 conv semantics (MXU is idle).
        proj = jnp.dot(w2, xa,
                       preferred_element_type=jnp.float32,
                       precision=lax.Precision.HIGHEST)

        xl = proj[0:1, :]                            # (1, HW) local attention
        xg = jnp.sum(proj[1:2, :], axis=1, keepdims=True)  # (1, 1) global (1/HW folded)

        wei = jax.nn.sigmoid(xl + xg + bias)         # (1, HW)

        # Broadcast wei over the C sublane rows; FMA-form fuse.
        o_ref[n] = (x + wei * d).astype(o_ref.dtype)


def fusionblock_pallas(landsat, modis, wl, bl, bn_l, wg, bg, bn_g):
    """landsat, modis: (N, C, H, W) NCHW, any float dtype.

    wl, wg: (C,) 1x1-conv weights (out_channels=1).
    bl, bg: scalar conv biases.
    bn_l, bn_g: (gamma, beta, running_mean, running_var) scalars (eval mode).
    """
    N, C, H, W = landsat.shape
    HW = H * W
    out_dtype = landsat.dtype

    # NCHW -> (N, C, HW): pure reshape, no transpose, no dtype change in HBM.
    x = landsat.reshape(N, C, HW)
    r = modis.reshape(N, C, HW)

    # Pad HW up to a lane-dense multiple of 128 (zero pad is exact: |0-0| = 0
    # contributes nothing to either conv; padded lanes are cropped afterwards).
    HW_pad = max(128, ((HW + 127) // 128) * 128)
    if HW_pad != HW:
        pad = HW_pad - HW
        x = jnp.pad(x, ((0, 0), (0, 0), (0, pad)))
        r = jnp.pad(r, ((0, 0), (0, 0), (0, pad)))

    # Fold BatchNorm (eval mode) into the conv weights & a single fused bias;
    # fold 1/HW into the global weight so the kernel only needs a lane-sum.
    g_l, beta_l, rm_l, rv_l = bn_l
    g_g, beta_g, rm_g, rv_g = bn_g
    scale_l = g_l * lax.rsqrt(rv_l + EPS)
    scale_g = g_g * lax.rsqrt(rv_g + EPS)
    wl_f = wl.astype(jnp.float32) * scale_l
    wg_f = wg.astype(jnp.float32) * (scale_g / HW)
    b_total = ((bl - rm_l) * scale_l + beta_l) + ((bg - rm_g) * scale_g + beta_g)

    w2 = jnp.stack([wl_f, wg_f], axis=0)                    # (2, C) f32
    bias = jnp.reshape(b_total, (1,)).astype(jnp.float32)   # SMEM scalar

    # Whole problem in one block: no grid, no step overhead, one DMA per array.
    itemsize = jnp.dtype(x.dtype).itemsize
    vmem_needed = (2 * N * C * HW_pad * itemsize            # x, r
                   + N * C * HW_pad * jnp.dtype(out_dtype).itemsize  # out
                   + 2 * C * 4)                             # weights
    vmem_limit = int(min(64 << 20, max(2 * vmem_needed + (1 << 20), 32 << 20)))

    # TODO(synk): for very large H*W that exceeds the per-generation VMEM budget
    # (v7x: 64 MiB physical / 32 MiB scoped), switch to a two-pass tiled kernel
    # (pass 1: pooled-sum accumulator over HW tiles, reduction axis 'arbitrary';
    # pass 2: local conv + sigmoid + fuse) with a parallel HW-tile grid so both
    # v7x TensorCores get balanced work, and per-gen T_HW / vmem_limit_bytes.
    # TODO(synk): if the caller does not reuse `landsat`, input_output_aliases
    # could alias the output onto it and save one HBM allocation.
    out = pl.pallas_call(
        _aff_kernel,
        out_shape=jax.ShapeDtypeStruct((N, C, HW_pad), out_dtype),
        in_specs=[
            pl.BlockSpec(memory_space=pltpu.MemorySpace.SMEM),   # fused bias
            pl.BlockSpec(memory_space=pltpu.MemorySpace.VMEM),   # x
            pl.BlockSpec(memory_space=pltpu.MemorySpace.VMEM),   # residual
            pl.BlockSpec(memory_space=pltpu.MemorySpace.VMEM),   # fused weights
        ],
        out_specs=pl.BlockSpec(memory_space=pltpu.MemorySpace.VMEM),
        compiler_params=pltpu.CompilerParams(vmem_limit_bytes=vmem_limit),
    )(bias, x, r, w2)

    if HW_pad != HW:
        out = out[:, :, :HW]
    return out.reshape(N, C, H, W)


def fusionblock_ref(landsat, modis, wl, bl, bn_l, wg, bg, bn_g):
    """Pure-JAX reference mirroring the PyTorch module (BatchNorm in eval mode)."""
    x = landsat.astype(jnp.float32)
    r = modis.astype(jnp.float32)
    xa = jnp.abs(x - r)                                            # (N, C, H, W)
    # local: 1x1 conv C->1 + BN(1)
    xl = jnp.einsum("nchw,c->nhw", xa, wl, precision="highest")[:, None] + bl
    xl = (xl - bn_l[2]) / jnp.sqrt(bn_l[3] + EPS) * bn_l[0] + bn_l[1]
    # global: adaptive avg pool (1,1) + 1x1 conv + BN(1)
    pooled = jnp.mean(xa, axis=(2, 3))                             # (N, C)
    xg = jnp.einsum("nc,c->n", pooled, wg, precision="highest")[:, None, None, None] + bg
    xg = (xg - bn_g[2]) / jnp.sqrt(bn_g[3] + EPS) * bn_g[0] + bn_g[1]
    wei = jax.nn.sigmoid(xl + xg)
    return x * (1.0 - wei) + r * wei


if __name__ == "__main__":
    key = jax.random.PRNGKey(0)
    k1, k2, k3, k4 = jax.random.split(key, 4)

    N, C, H, W = 2, 64, 16, 16  # AFF hardcodes channels=64

    landsat = jax.random.normal(k1, (N, C, H, W), dtype=jnp.float32)
    modis = jax.random.normal(k2, (N, C, H, W), dtype=jnp.float32)

    # Deterministic synthetic params: Conv2d(64,1,1) + BatchNorm2d(1) (x2 branches)
    wl = jax.random.normal(k3, (C,), dtype=jnp.float32) * 0.1
    bl = jnp.float32(0.05)
    wg = jax.random.normal(k4, (C,), dtype=jnp.float32) * 0.1
    bg = jnp.float32(-0.05)
    # BatchNorm (eval): gamma, beta, running_mean, running_var
    bn_l = (jnp.float32(1.2), jnp.float32(0.1), jnp.float32(0.02), jnp.float32(0.9))
    bn_g = (jnp.float32(0.8), jnp.float32(-0.1), jnp.float32(-0.01), jnp.float32(1.1))
    # TODO(synk): PyTorch BatchNorm2d in train mode uses batch statistics; eval-mode
    # (running-stat affine) semantics are what is implemented here.

    out = fusionblock_pallas(landsat, modis, wl, bl, bn_l, wg, bg, bn_g)
    out = jax.block_until_ready(out)

    ref = fusionblock_ref(landsat, modis, wl, bl, bn_l, wg, bg, bn_g)
    np.testing.assert_allclose(np.asarray(out), np.asarray(ref), rtol=1e-5, atol=1e-5)

    print("KERNEL_OK")
</pallas_src>

<mosaic_0001>
module attributes {stable_mosaic.version = 11 : i64} {
  func.func @_aff_kernel(%arg0: memref<1xf32, #tpu.memory_space<smem>>, %arg1: memref<2x64x256xf32, #tpu.memory_space<vmem>>, %arg2: memref<2x64x256xf32, #tpu.memory_space<vmem>>, %arg3: memref<2x64xf32, #tpu.memory_space<vmem>>, %arg4: memref<2x64x256xf32, #tpu.memory_space<vmem>>) attributes {dimension_semantics = [], scalar_prefetch = 0 : i64, scratch_operands = 0 : i64, tpu.core_type = #tpu.core_type<tc>} {
    %c0 = arith.constant 0 : index
    %c0_0 = arith.constant 0 : index
    %0 = vector.load %arg3[%c0, %c0_0] : memref<2x64xf32, #tpu.memory_space<vmem>>, vector<2x64xf32>
    %c0_1 = arith.constant 0 : index
    %1 = memref.load %arg0[%c0_1] : memref<1xf32, #tpu.memory_space<smem>>
    %c0_2 = arith.constant 0 : index
    %c0_3 = arith.constant 0 : index
    %c0_4 = arith.constant 0 : index
    %2 = vector.load %arg1[%c0_2, %c0_3, %c0_4] : memref<2x64x256xf32, #tpu.memory_space<vmem>>, vector<1x64x256xf32>
    %3 = vector.shape_cast %2 : vector<1x64x256xf32> to vector<64x256xf32>
    %c0_5 = arith.constant 0 : index
    %c0_6 = arith.constant 0 : index
    %c0_7 = arith.constant 0 : index
    %4 = vector.load %arg2[%c0_5, %c0_6, %c0_7] : memref<2x64x256xf32, #tpu.memory_space<vmem>>, vector<1x64x256xf32>
    %5 = vector.shape_cast %4 : vector<1x64x256xf32> to vector<64x256xf32>
    %6 = arith.subf %5, %3 : vector<64x256xf32>
    %7 = math.absf %6 : vector<64x256xf32>
    %cst = arith.constant dense<0.000000e+00> : vector<2x256xf32>
    %8 = tpu.matmul %0, %7, %cst {dimension_numbers = #tpu.dot_dimension_numbers<[1], [0], [0], [1], [0, 0, 1, 1], [], []>, precision = #tpu.contract_precision<fp32>} : vector<2x64xf32>, vector<64x256xf32>, vector<2x256xf32> -> vector<2x256xf32>
    %9 = vector.extract_strided_slice %8 {offsets = [0, 0], sizes = [1, 256], strides = [1, 1]} : vector<2x256xf32> to vector<1x256xf32>
    %10 = vector.extract_strided_slice %8 {offsets = [1, 0], sizes = [1, 256], strides = [1, 1]} : vector<2x256xf32> to vector<1x256xf32>
    %cst_8 = arith.constant dense<0.000000e+00> : vector<1xf32>
    %11 = vector.multi_reduction <add>, %10, %cst_8 [1] : vector<1x256xf32> to vector<1xf32>
    %12 = vector.shape_cast %11 : vector<1xf32> to vector<1x1xf32>
    %13 = vector.broadcast %12 : vector<1x1xf32> to vector<1x256xf32>
    %14 = arith.addf %9, %13 : vector<1x256xf32>
    %15 = vector.broadcast %1 : f32 to vector<1x256xf32>
    %16 = arith.addf %14, %15 : vector<1x256xf32>
    %17 = arith.negf %16 : vector<1x256xf32>
    %18 = math.exp %17 : vector<1x256xf32>
    %cst_9 = arith.constant 1.000000e+00 : f32
    %19 = vector.broadcast %cst_9 : f32 to vector<1x256xf32>
    %20 = arith.addf %19, %18 : vector<1x256xf32>
    %21 = arith.divf %19, %20 : vector<1x256xf32>
    %22 = vector.broadcast %21 : vector<1x256xf32> to vector<64x256xf32>
    %23 = arith.mulf %22, %6 : vector<64x256xf32>
    %24 = arith.addf %3, %23 : vector<64x256xf32>
    %c0_10 = arith.constant 0 : index
    %c0_11 = arith.constant 0 : index
    %c0_12 = arith.constant 0 : index
    %25 = vector.load %arg4[%c0_10, %c0_11, %c0_12] : memref<2x64x256xf32, #tpu.memory_space<vmem>>, vector<1x64x256xf32>
    %26 = vector.shape_cast %25 : vector<1x64x256xf32> to vector<64x256xf32>
    %27 = vector.shape_cast %24 : vector<64x256xf32> to vector<1x64x256xf32>
    tpu.vector_store %arg4[%c0_10, %c0_11, %c0_12], %27 {strides = array<i32>} : memref<2x64x256xf32, #tpu.memory_space<vmem>>, vector<1x64x256xf32>,
    %c1 = arith.constant 1 : index
    %c0_13 = arith.constant 0 : index
    %c0_14 = arith.constant 0 : index
    %28 = vector.load %arg1[%c1, %c0_13, %c0_14] : memref<2x64x256xf32, #tpu.memory_space<vmem>>, vector<1x64x256xf32>
    %29 = vector.shape_cast %28 : vector<1x64x256xf32> to vector<64x256xf32>
    %c1_15 = arith.constant 1 : index
    %c0_16 = arith.constant 0 : index
    %c0_17 = arith.constant 0 : index
    %30 = vector.load %arg2[%c1_15, %c0_16, %c0_17] : memref<2x64x256xf32, #tpu.memory_space<vmem>>, vector<1x64x256xf32>
    %31 = vector.shape_cast %30 : vector<1x64x256xf32> to vector<64x256xf32>
    %32 = arith.subf %31, %29 : vector<64x256xf32>
    %33 = math.absf %32 : vector<64x256xf32>
    %cst_18 = arith.constant dense<0.000000e+00> : vector<2x256xf32>
    %34 = tpu.matmul %0, %33, %cst_18 {dimension_numbers = #tpu.dot_dimension_numbers<[1], [0], [0], [1], [0, 0, 1, 1], [], []>, precision = #tpu.contract_precision<fp32>} : vector<2x64xf32>, vector<64x256xf32>, vector<2x256xf32> -> vector<2x256xf32>
    %35 = vector.extract_strided_slice %34 {offsets = [0, 0], sizes = [1, 256], strides = [1, 1]} : vector<2x256xf32> to vector<1x256xf32>
    %36 = vector.extract_strided_slice %34 {offsets = [1, 0], sizes = [1, 256], strides = [1, 1]} : vector<2x256xf32> to vector<1x256xf32>
    %cst_19 = arith.constant dense<0.000000e+00> : vector<1xf32>
    %37 = vector.multi_reduction <add>, %36, %cst_19 [1] : vector<1x256xf32> to vector<1xf32>
    %38 = vector.shape_cast %37 : vector<1xf32> to vector<1x1xf32>
    %39 = vector.broadcast %38 : vector<1x1xf32> to vector<1x256xf32>
    %40 = arith.addf %35, %39 : vector<1x256xf32>
    %41 = vector.broadcast %1 : f32 to vector<1x256xf32>
    %42 = arith.addf %40, %41 : vector<1x256xf32>
    %43 = arith.negf %42 : vector<1x256xf32>
    %44 = math.exp %43 : vector<1x256xf32>
    %cst_20 = arith.constant 1.000000e+00 : f32
    %45 = vector.broadcast %cst_20 : f32 to vector<1x256xf32>
    %46 = arith.addf %45, %44 : vector<1x256xf32>
    %47 = arith.divf %45, %46 : vector<1x256xf32>
    %48 = vector.broadcast %47 : vector<1x256xf32> to vector<64x256xf32>
    %49 = arith.mulf %48, %32 : vector<64x256xf32>
    %50 = arith.addf %29, %49 : vector<64x256xf32>
    %c1_21 = arith.constant 1 : index
    %c0_22 = arith.constant 0 : index
    %c0_23 = arith.constant 0 : index
    %51 = vector.load %arg4[%c1_21, %c0_22, %c0_23] : memref<2x64x256xf32, #tpu.memory_space<vmem>>, vector<1x64x256xf32>
    %52 = vector.shape_cast %51 : vector<1x64x256xf32> to vector<64x256xf32>
    %53 = vector.shape_cast %50 : vector<64x256xf32> to vector<1x64x256xf32>
    tpu.vector_store %arg4[%c1_21, %c0_22, %c0_23], %53 {strides = array<i32>} : memref<2x64x256xf32, #tpu.memory_space<vmem>>, vector<1x64x256xf32>,
    return
  }
}

</mosaic_0001>

<bundles_post_ra>
// kernel: tpu_custom_call.1
= control target key start
LH: loop header
LB: loop body
LE: loop exit
PB: predicated region body
PF: predicated region fallthrough
CT: control target
= control target key end

     0   :  { %10 = vsyncpa [#allocation4], 0  ;;  %s2257_s0 = inlined_call_operand.<no memory space> [shape: f32[1], index: 0, kind: input, shape index: {}]   ;;  %s2258_s1 = inlined_call_operand.hbm [shape: f32[2,64,256], index: 1, kind: input, shape index: {}]   ;;  %s2259_s2 = inlined_call_operand.hbm [shape: f32[2,64,256], index: 2, kind: input, shape index: {}]   ;;  %s2260_s3 = inlined_call_operand.vmem [shape: f32[2,64], index: 3, kind: input, shape index: {}]   ;;  %s2261_s4 = inlined_call_operand.hbm [shape: f32[2,64,256], index: 4, kind: output, shape index: {}]  }
   0x1   :  { %11 = vsyncpa [#allocation7], 0 }
   0x2   :  { %12 = vsyncpa [#allocation5], 0  ;;  %s19_s17 = sshll.u32 %s2258_s1, 4  ;;  %s1478_s18 = smov [#allocation3]   ;;  %s20_s17 = int_to_ptr.hbm [resolvable:$true] %s19_s17 }
   0x3   :  { %s21_s19 = sshll.u32 %s1478_s18, 4  ;;  %s32_s22 = sshll.u32 %s2259_s2, 4  ;;  %s22_s19 = int_to_ptr.vmem [resolvable:$true] %s21_s19  ;;  %s33_s22 = int_to_ptr.hbm [resolvable:$true] %s32_s22 }
   0x4   :  { %s1479_s23 = smov 256   ;;  %s1480_s24 = smov 16  }
   0x5   :  { %27 = dma.hbm_to_vmem [thread:$0]  %s20_s17, 4096, %s22_s19, [#allocation4], %s1479_s23, %s1479_s23, %s1480_s24  }
   0x6   :  { %s1481_s25 = smov [#allocation6]  }
   0x7   :  { %s34_s26 = sshll.u32 %s1481_s25, 4  ;;  %s35_s26 = int_to_ptr.vmem [resolvable:$true] %s34_s26 }
   0x8   :  { %40 = dma.hbm_to_vmem [thread:$0]  %s33_s22, 4096, %s35_s26, [#allocation7], %s1479_s23, %s1479_s23, %s1480_s24  }
   0x9   :  { %1472 = dma.done.wait [#allocation4], 4096  }
   0xa   :  { %1473 = vsyncadd [#allocation4], 4294963200 }
   0xb   :  { %1474 = dma.done.wait [#allocation7], 4096  }
   0xc   :  { %1475 = vsyncadd [#allocation7], 4294963200  ;;  %v67_v0 = vld [vmem:[#allocation3 + $0x70] sm:$0xff]  ;;  %v65_v2 = vld [vmem:[#allocation3 + $0x60] sm:$0xff]  ;;  %vm117_vm0 = vcmask 523264   ;;  %vm595_vm1 = vcmask 1041409  }
   0xd   :  { %v83_v1 = vld [vmem:[#allocation6 + $0x70] sm:$0xff]  ;;  %v81_v4 = vld [vmem:[#allocation6 + $0x60] sm:$0xff]  ;;  %v68_v48 = vld [vmem:[#allocation3 + $0x78] sm:$0xff]  ;;  %s1344_s5 = sshll.u32 %s2261_s4, 4  ;;  %s1345_s5 = int_to_ptr.hbm [resolvable:$true] %s1344_s5 }
   0xe   :  { %v1520_v3 = vsub.f32 %v83_v1, %v67_v0  ;;  %v63_v5 = vld [vmem:[#allocation3 + $0x50] sm:$0xff]  ;;  %v1522_v7 = vsub.f32 %v81_v4, %v65_v2  ;;  %v61_v9 = vld [vmem:[#allocation3 + $0x40] sm:$0xff]  ;;  %v84_v49 = vld [vmem:[#allocation6 + $0x78] sm:$0xff] }
   0xf   :  { %v79_v6 = vld [vmem:[#allocation6 + $0x50] sm:$0xff]  ;;  %v77_v10 = vld [vmem:[#allocation6 + $0x40] sm:$0xff]  ;;  %v66_v58 = vld [vmem:[#allocation3 + $0x68] sm:$0xff]  ;;  %v1612_v63 = vsub.f32 %v84_v49, %v68_v48 }
  0x10   :  { %2301 = vst [vmem:[#allocation12_spill] sm:$0xff] %v1520_v3  ;;  %v1524_v8 = vsub.f32 %v79_v6, %v63_v5  ;;  %v59_v11 = vld [vmem:[#allocation3 + $0x30] sm:$0xff]  ;;  %v115_v12 = vand.u32 2147483647, %v1520_v3  ;;  %v1527_v13 = vsub.f32 %v77_v10, %v61_v9  ;;  %v57_v15 = vld [vmem:[#allocation3 + $0x20] sm:$0xff]  ;;  %v82_v59 = vld [vmem:[#allocation6 + $0x68] sm:$0xff] }
  0x11   :  { %v75_v14 = vld [vmem:[#allocation6 + $0x30] sm:$0xff]  ;;  %v73_v16 = vld [vmem:[#allocation6 + $0x20] sm:$0xff]  ;;  %v113_v17 = vand.u32 2147483647, %v1522_v7  ;;  %2302 = vst [vmem:[#allocation13_spill] sm:$0xff] %v1612_v63  ;;  %v64_v0 = vld [vmem:[#allocation3 + $0x58] sm:$0xff] }
  0x12   :  { %v111_v18 = vand.u32 2147483647, %v1524_v8  ;;  %v1531_v19 = vsub.f32 %v75_v14, %v59_v11  ;;  %v1533_v20 = vsub.f32 %v73_v16, %v57_v15  ;;  %v55_v21 = vld [vmem:[#allocation3 + $0x10] sm:$0xff]  ;;  %v1535_v23 = vand.u32 4294901760, %v115_v12  ;;  %v53_v26 = vld [vmem:[#allocation3] sm:$0xff]  ;;  %v80_v1 = vld [vmem:[#allocation6 + $0x58] sm:$0xff] }
  0x13   :  { %v71_v22 = vld [vmem:[#allocation6 + $0x10] sm:$0xff]  ;;  %v109_v24 = vand.u32 2147483647, %v1527_v13  ;;  %v69_v27 = vld [vmem:[#allocation6] sm:$0xff]  ;;  %v1540_v28 = vand.u32 4294901760, %v113_v17  ;;  %v62_v2 = vld [vmem:[#allocation3 + $0x48] sm:$0xff] }
  0x14   :  { %v1538_v25 = vsub.f32 %v71_v22, %v55_v21  ;;  %v1542_v29 = vand.u32 4294901760, %v111_v18  ;;  %v107_v30 = vand.u32 2147483647, %v1531_v19  ;;  %v105_v31 = vand.u32 2147483647, %v1533_v20  ;;  %130 = vmatpush.msra.mxu0 %v1535_v23  ;;  %262 = vmatpush.msra.mxu3 %v1535_v23  ;;  %v78_v10 = vld [vmem:[#allocation6 + $0x48] sm:$0xff] }
  0x15   :  { %v1548_v32 = vsub.f32 %v115_v12, %v1535_v23  ;;  %v1551_v33 = vand.u32 4294901760, %v109_v24  ;;  %v1554_v35 = vsub.f32 %v69_v27, %v53_v26  ;;  %v1557_v36 = vsub.f32 %v113_v17, %v1540_v28  ;;  %v60_v11 = vld [vmem:[#allocation3 + $0x38] sm:$0xff]  ;;  %v74_v21 = vld [vmem:[#allocation6 + $0x28] sm:$0xff] }
  0x16   :  { %v103_v34 = vand.u32 2147483647, %v1538_v25  ;;  %v1560_v37 = vsub.f32 %v111_v18, %v1542_v29  ;;  %v1562_v38 = vand.u32 4294901760, %v107_v30  ;;  %v1564_v39 = vand.u32 4294901760, %v105_v31  ;;  %132 = vmatpush.msra.mxu0 %v1540_v28  ;;  %264 = vmatpush.msra.mxu3 %v1540_v28  ;;  %v76_v12 = vld [vmem:[#allocation6 + $0x38] sm:$0xff]  ;;  %v58_v18 = vld [vmem:[#allocation3 + $0x28] sm:$0xff] }
  0x17   :  { %225 = vmatpush.msra.mxu2 %v1548_v32  ;;  %v164_v40 = vand.u32 4294901760, %v1548_v32  ;;  %v1570_v41 = vsub.f32 %v109_v24, %v1551_v33  ;;  %v101_v43 = vand.u32 2147483647, %v1554_v35  ;;  %v170_v44 = vand.u32 4294901760, %v1557_v36 }
  0x18   :  { %v1572_v42 = vand.u32 4294901760, %v103_v34  ;;  %v176_v45 = vand.u32 4294901760, %v1560_v37  ;;  %v1579_v46 = vsub.f32 %v107_v30, %v1562_v38  ;;  %v1582_v47 = vsub.f32 %v105_v31, %v1564_v39  ;;  %134 = vmatpush.msra.mxu0 %v1542_v29  ;;  %266 = vmatpush.msra.mxu3 %v1542_v29 }
  0x19   :  { %228 = vmatpush.msra.mxu2 %v1557_v36  ;;  %v165_v50 = vsub.f32 %v1548_v32, %v164_v40  ;;  %v182_v51 = vand.u32 4294901760, %v1570_v41  ;;  %v1593_v53 = vand.u32 4294901760, %v101_v43  ;;  %v171_v54 = vsub.f32 %v1557_v36, %v170_v44 }
  0x1a   :  { %v1591_v52 = vsub.f32 %v103_v34, %v1572_v42  ;;  %v177_v55 = vsub.f32 %v1560_v37, %v176_v45  ;;  %v2267_v56 = vand.u32 4294901760, %v1579_v46  ;;  %v2265_v57 = vand.u32 4294901760, %v1582_v47  ;;  %136 = vmatpush.msra.mxu0 %v1551_v33  ;;  %268 = vmatpush.msra.mxu3 %v1551_v33 }
  0x1b   :  { %v166_v60 = vand.u32 4294901760, %v165_v50  ;;  %231 = vmatpush.msra.mxu2 %v1560_v37  ;;  %v183_v61 = vsub.f32 %v1570_v41, %v182_v51  ;;  %v1610_v62 = vsub.f32 %v101_v43, %v1593_v53  ;;  %v172_v4 = vand.u32 4294901760, %v171_v54 }
  0x1c   :  { %v178_v5 = vand.u32 4294901760, %v177_v55  ;;  %v189_v6 = vsub.f32 %v1579_v46, %v2267_v56  ;;  %v1621_v9 = vsub.f32 %v1582_v47, %v2265_v57  ;;  %v116_v15 = vand.u32 2147483647, %v1612_v63  ;;  %138 = vmatpush.msra.mxu0 %v1562_v38  ;;  %270 = vmatpush.msra.mxu3 %v1562_v38  ;;  %v1655_v55 = vld [vmem:[#allocation3 + $0x18] sm:$0xff] }
  0x1d   :  { %167 = vmatpush.msra.mxu1 %v166_v60  ;;  %234 = vmatpush.msra.mxu2 %v1570_v41  ;;  %v184_v14 = vand.u32 4294901760, %v183_v61  ;;  %v2264_v16 = vand.u32 4294901760, %v1591_v52  ;;  %v1626_v17 = vsub.f32 %v82_v59, %v66_v58  ;;  %v2263_v26 = vand.u32 4294901760, %v1610_v62  ;;  %v72_v58 = vld [vmem:[#allocation6 + $0x18] sm:$0xff] }
  0x1e   :  { %v190_v22 = vand.u32 4294901760, %v189_v6  ;;  %v196_v24 = vand.u32 4294901760, %v1621_v9  ;;  %v1632_v27 = vsub.f32 %v80_v1, %v64_v0  ;;  %v1635_v30 = vand.u32 4294901760, %v116_v15  ;;  %140 = vmatpush.msra.mxu0 %v1564_v39  ;;  %272 = vmatpush.msra.mxu3 %v1564_v39  ;;  %v51_v1 = vld [vmem:[%s2260_s3] sm:$0x3] }
  0x1f   :  { %173 = vmatpush.msra.mxu1 %v172_v4  ;;  %237 = vmatpush.msra.mxu2 %v1579_v46  ;;  %v201_v31 = vsub.f32 %v1591_v52, %v2264_v16  ;;  %v114_v34 = vand.u32 2147483647, %v1626_v17  ;;  %v1641_v43 = vsub.f32 %v78_v10, %v62_v2  ;;  %v1648_v48 = vsub.f32 %v1610_v62, %v2263_v26  ;;  %v1715_v26 = vld [vmem:[#allocation3 + $0x8] sm:$0xff] }
  0x20   :  { %v112_v49 = vand.u32 2147483647, %v1632_v27  ;;  %v1651_v50 = vsub.f32 %v76_v12, %v60_v11  ;;  %v1653_v54 = vsub.f32 %v74_v21, %v58_v18  ;;  %v1661_v61 = vsub.f32 %v116_v15, %v1635_v30  ;;  %142 = vmatpush.msra.mxu0 %v1572_v42  ;;  %274 = vmatpush.msra.mxu3 %v1572_v42 }
  0x21   :  { %179 = vmatpush.msra.mxu1 %v178_v5  ;;  %240 = vmatpush.msra.mxu2 %v1582_v47  ;;  %v202_v59 = vand.u32 4294901760, %v201_v31  ;;  %v1658_v60 = vand.u32 4294901760, %v114_v34  ;;  %v110_v0 = vand.u32 2147483647, %v1641_v43  ;;  %v208_v2 = vand.u32 4294901760, %v1648_v48 }
  0x22   :  { %v1670_v4 = vand.u32 4294901760, %v112_v49  ;;  %v108_v5 = vand.u32 2147483647, %v1651_v50  ;;  %v106_v6 = vand.u32 2147483647, %v1653_v54  ;;  %v2262_v9 = vand.u32 4294901760, %v1661_v61  ;;  %144 = vmatpush.msra.mxu0 %v1593_v53  ;;  %276 = vmatpush.msra.mxu3 %v1593_v53 }
  0x23   :  { %185 = vmatpush.msra.mxu1 %v184_v14  ;;  %243 = vmatpush.msra.mxu2 %v1591_v52  ;;  %v1677_v10 = vsub.f32 %v114_v34, %v1658_v60  ;;  %v1679_v11 = vand.u32 4294901760, %v110_v0  ;;  %v1682_v12 = vsub.f32 %v72_v58, %v1655_v55  ;;  %v119_v21 = vsel %vm117_vm0, %v51_v1, 0 }
  0x24   :  { %v1687_v15 = vsub.f32 %v112_v49, %v1670_v4  ;;  %v1689_v14 = vand.u32 4294901760, %v108_v5  ;;  %v1691_v18 = vand.u32 4294901760, %v106_v6  ;;  %v402_v31 = vsub.f32 %v1661_v61, %v2262_v9  ;;  %295 = vmatpush.msrb.mxu0 %v164_v40 }
  0x25   :  { %191 = vmatpush.msra.mxu1 %v190_v22  ;;  %246 = vmatpush.msra.mxu2 %v1610_v62  ;;  %v2266_v34 = vand.u32 4294901760, %v1677_v10  ;;  %v1700_v48 = vsub.f32 %v110_v0, %v1679_v11  ;;  %v104_v49 = vand.u32 2147483647, %v1682_v12  ;;  %v1713_v9 = vand.u32 4294901760, %v119_v21  ;;  %v70_v0 = vld [vmem:[#allocation6 + $0x8] sm:$0xff] }
  0x26   :  { %v413_v22 = vand.u32 4294901760, %v1687_v15  ;;  %v1708_v58 = vsub.f32 %v108_v5, %v1689_v14  ;;  %v1711_v1 = vsub.f32 %v106_v6, %v1691_v18  ;;  %v403_v16 = vand.u32 4294901760, %v402_v31  ;;  %299 = vmatpush.msrb.mxu0 %v170_v44 }
  0x27   :  { %367 = vmatpush.msrb.mxu2 %v1635_v30  ;;  %197 = vmatpush.msra.mxu1 %v196_v24  ;;  %v408_v32 = vsub.f32 %v1677_v10, %v2266_v34  ;;  %v419_v40 = vand.u32 4294901760, %v1700_v48  ;;  %v1721_v57 = vand.u32 4294901760, %v104_v49  ;;  %v1732_v31 = vsub.f32 %v119_v21, %v1713_v9 }
  0x28   :  { %v414_v5 = vsub.f32 %v1687_v15, %v413_v22  ;;  %v425_v24 = vand.u32 4294901760, %v1708_v58  ;;  %v431_v6 = vand.u32 4294901760, %v1711_v1  ;;  %404 = vmatpush.msrb.mxu3 %v403_v16  ;;  %v1738_v44 = vsub.f32 %v70_v0, %v1715_v26  ;;  %303 = vmatpush.msrb.mxu0 %v176_v45 }
  0x29   :  { %369 = vmatpush.msrb.mxu2 %v1658_v60  ;;  %203 = vmatpush.msra.mxu1 %v202_v59  ;;  %v409_v34 = vand.u32 4294901760, %v408_v32  ;;  %v420_v36 = vsub.f32 %v1700_v48, %v419_v40  ;;  %v1741_v56 = vsub.f32 %v104_v49, %v1721_v57  ;;  %v1755_v37 = vand.u32 4294901760, %v1732_v31 }
  0x2a   :  { %v415_v21 = vand.u32 4294901760, %v414_v5  ;;  %v426_v16 = vsub.f32 %v1708_v58, %v425_v24  ;;  %v432_v59 = vsub.f32 %v1711_v1, %v431_v6  ;;  %v102_v49 = vand.u32 2147483647, %v1738_v44  ;;  %307 = vmatpush.msrb.mxu0 %v182_v51  ;;  %249 = vmatmul.f32.vlgmr.msra.gmra.mxu2 %v1732_v31 }
  0x2b   :  { %371 = vmatpush.msrb.mxu2 %v1670_v4  ;;  %209 = vmatpush.msra.mxu1 %v208_v2  ;;  %v421_v0 = vand.u32 4294901760, %v420_v36  ;;  %v2269_v32 = vand.u32 4294901760, %v1741_v56  ;;  %v2303_v2 = vand.u32 4294901760, %v1579_v46  ;;  %v148_v41 = vsub.f32 %v1732_v31, %v1755_v37 }
  0x2c   :  { %410 = vmatpush.msrb.mxu3 %v409_v34  ;;  %v427_v45 = vand.u32 4294901760, %v426_v16  ;;  %v1761_v5 = vand.u32 4294901760, %v102_v49  ;;  %v2305_v36 = vand.u32 4294901760, %v1591_v52  ;;  %v712_v16 = vld [vmem:[#allocation3 + $0xf0] sm:$0xff]  ;;  %v2306_v52 = vand.u32 4294901760, %v1610_v62  ;;  %211 = vmatmul.f32.vlgmr.msra.gmra.mxu1 %v1713_v9 }
  0x2d   :  { %338 = vmatpush.msrb.mxu1 %v1535_v23  ;;  %373 = vmatpush.msrb.mxu2 %v1679_v11  ;;  %v438_v34 = vsub.f32 %v1741_v56, %v2269_v32  ;;  %v433_v23 = vand.u32 4294901760, %v432_v59  ;;  %v729_v59 = vld [vmem:[#allocation6 + $0xf0] sm:$0xff]  ;;  %v2309_v62 = vand.u32 4294901760, %v1661_v61  ;;  %v1895_v32 = vld [vmem:[#allocation3 + $0xd8] sm:$0xff] }
  0x2e   :  { %416 = vmatpush.msrb.mxu3 %v415_v21  ;;  %311 = vmatpush.msrb.mxu0 %v2303_v2  ;;  %v1773_v51 = vsub.f32 %v102_v49, %v1761_v5  ;;  %v708_v2 = vld [vmem:[#allocation3 + $0xd0] sm:$0xff]  ;;  %2325 = vst [vmem:[#allocation30_spill] sm:$0xff] %v1895_v32 }
  0x2f   :  { %340 = vmatpush.msrb.mxu1 %v1540_v28  ;;  %375 = vmatpush.msrb.mxu2 %v1689_v14  ;;  %v2304_v28 = vand.u32 4294901760, %v1582_v47  ;;  %v439_v21 = vand.u32 4294901760, %v438_v34  ;;  %v725_v34 = vld [vmem:[#allocation6 + $0xd0] sm:$0xff] }
  0x30   :  { %422 = vmatpush.msrb.mxu3 %v421_v0  ;;  %v2268_v46 = vand.u32 4294901760, %v1773_v51  ;;  %v727_v0 = vld [vmem:[#allocation6 + $0xe0] sm:$0xff] }
  0x31   :  { %342 = vmatpush.msrb.mxu1 %v1542_v29  ;;  %315 = vmatpush.msrb.mxu0 %v2304_v28  ;;  %v1784_v29 = vand.u32 4294901760, %v148_v41  ;;  %v723_v41 = vld [vmem:[#allocation6 + $0xc0] sm:$0xff]  ;;  %v1808_v28 = vsub.f32 %v725_v34, %v708_v2  ;;  %v730_v2 = vld [vmem:[#allocation6 + $0xf8] sm:$0xff] }
  0x32   :  { %377 = vmatpush.msrb.mxu2 %v1691_v18  ;;  %428 = vmatpush.msrb.mxu3 %v427_v45  ;;  %v444_v47 = vsub.f32 %v1773_v51, %v2268_v46  ;;  %v1794_v45 = vsub.f32 %v729_v59, %v712_v16  ;;  %v1823_v59 = vld [vmem:[#allocation3 + $0xa0] sm:$0xff] }
  0x33   :  { %344 = vmatpush.msrb.mxu1 %v1551_v33  ;;  %319 = vmatpush.msrb.mxu0 %v2305_v36  ;;  %v710_v33 = vld [vmem:[#allocation3 + $0xe0] sm:$0xff]  ;;  %2311 = vst [vmem:[#allocation17_spill] sm:$0xff] %v1808_v28  ;;  %v1812_v36 = vld [vmem:[#allocation3 + $0xb0] sm:$0xff] }
  0x34   :  { %379 = vmatpush.msrb.mxu2 %v1721_v57  ;;  %434 = vmatpush.msrb.mxu3 %v433_v23  ;;  %v445_v49 = vand.u32 4294901760, %v444_v47  ;;  %2307 = vst [vmem:[#allocation14_spill] sm:$0xff] %v1794_v45  ;;  %v1804_v23 = vld [vmem:[#allocation3 + $0xc0] sm:$0xff] }
  0x35   :  { %346 = vmatpush.msrb.mxu1 %v1562_v38  ;;  %323 = vmatpush.msrb.mxu0 %v2306_v52  ;;  %v1799_v38 = vsub.f32 %v727_v0, %v710_v33  ;;  %2310 = vst [vmem:[#allocation16_spill] sm:$0xff] %v1804_v23  ;;  %v719_v47 = vld [vmem:[#allocation6 + $0xa0] sm:$0xff]  ;;  %v757_v33 = vand.u32 2147483647, %v1808_v28  ;;  %v717_v52 = vld [vmem:[#allocation6 + $0x90] sm:$0xff] }
  0x36   :  { %381 = vmatpush.msrb.mxu2 %v1761_v5  ;;  %440 = vmatpush.msrb.mxu3 %v439_v21  ;;  %2312 = vst [vmem:[#allocation18_spill] sm:$0xff] %v1812_v36  ;;  %v721_v21 = vld [vmem:[#allocation6 + $0xb0] sm:$0xff] }
  0x37   :  { %348 = vmatpush.msrb.mxu1 %v1564_v39  ;;  %150 = vmatmul.f32.vlgmr.msra.gmra.mxu0 %v1784_v29  ;;  %2308 = vst [vmem:[#allocation15_spill] sm:$0xff] %v1799_v38  ;;  %v761_v39 = vand.u32 2147483647, %v1794_v45  ;;  %v759_v16 = vand.u32 2147483647, %v1799_v38  ;;  %v1832_v0 = vsub.f32 %v721_v21, %v1812_v36  ;;  %v1912_v45 = vld [vmem:[#allocation3 + $0xc8] sm:$0xff] }
  0x38   :  { %280 = vmatmul.f32.vlgmr.msra.gmra.mxu3 %v1755_v37  ;;  %462 = vmatpush.msra.mxu0 %v1661_v61  ;;  %v2313_v61 = vand.u32 4294901760, %v1677_v10  ;;  %2315 = vst [vmem:[#allocation20_spill] sm:$0xff] %v1823_v59  ;;  %v1932_v38 = vld [vmem:[#allocation3 + $0xb8] sm:$0xff]  ;;  %v1951_v36 = vld [vmem:[#allocation3 + $0xa8] sm:$0xff] }
  0x39   :  { %532 = vmatpush.msra.mxu2 %v2309_v62  ;;  %350 = vmatpush.msrb.mxu1 %v1572_v42  ;;  %v1819_v42 = vsub.f32 %v723_v41, %v1804_v23  ;;  %2316 = vst [vmem:[#allocation21_spill] sm:$0xff] %v1832_v0  ;;  %v1862_v62 = vld [vmem:[#allocation3 + $0x80] sm:$0xff]  ;;  %v724_v23 = vld [vmem:[#allocation6 + $0xc8] sm:$0xff] }
  0x3a   :  { %446 = vmatpush.msrb.mxu3 %v445_v49  ;;  %465 = vmatpush.msra.mxu0 %v1677_v10  ;;  %v1828_v10 = vand.u32 4294901760, %v761_v39  ;;  %v1849_v49 = vld [vmem:[#allocation3 + $0xf8] sm:$0xff]  ;;  %2321 = vst [vmem:[#allocation26_spill] sm:$0xff] %v1862_v62  ;;  %v715_v41 = vld [vmem:[#allocation6 + $0x80] sm:$0xff] }
  0x3b   :  { %536 = vmatpush.msra.mxu2 %v2313_v61  ;;  %2314 = vst [vmem:[#allocation19_spill] sm:$0xff] %v1819_v42  ;;  %352 = vmatpush.msrb.mxu1 %v1593_v53  ;;  %v1836_v53 = vld [vmem:[#allocation3 + $0x90] sm:$0xff]  ;;  %v1876_v61 = vsub.f32 %v730_v2, %v1849_v49 }
  0x3c   :  { %575 = vmatpush.msra.mxu3 %v1635_v30  ;;  %468 = vmatpush.msra.mxu0 %v1687_v15  ;;  %2317 = vst [vmem:[#allocation22_spill] sm:$0xff] %v1836_v53  ;;  %v755_v15 = vand.u32 2147483647, %v1819_v42  ;;  %v1860_v34 = vsub.f32 %v717_v52, %v1836_v53  ;;  %v728_v52 = vld [vmem:[#allocation6 + $0xe8] sm:$0xff]  ;;  %v718_v42 = vld [vmem:[#allocation6 + $0x98] sm:$0xff] }
  0x3d   :  { %499 = vmatpush.msra.mxu1 %v1635_v30  ;;  %540 = vmatpush.msra.mxu2 %v413_v22  ;;  %v1841_v30 = vand.u32 4294901760, %v759_v16  ;;  %v1845_v22 = vsub.f32 %v719_v47, %v1823_v59  ;;  %2319 = vst [vmem:[#allocation24_spill] sm:$0xff] %v1849_v49  ;;  %v1878_v47 = vld [vmem:[#allocation3 + $0xe8] sm:$0xff]  ;;  %v726_v49 = vld [vmem:[#allocation6 + $0xd8] sm:$0xff] }
  0x3e   :  { %577 = vmatpush.msra.mxu3 %v1658_v60  ;;  %471 = vmatpush.msra.mxu0 %v1700_v48  ;;  %v1856_v48 = vand.u32 4294901760, %v757_v33  ;;  %2320 = vst [vmem:[#allocation25_spill] sm:$0xff] %v1860_v34  ;;  %v749_v46 = vand.u32 2147483647, %v1860_v34 }
  0x3f   :  { %501 = vmatpush.msra.mxu1 %v1658_v60  ;;  %544 = vmatpush.msra.mxu2 %v419_v40  ;;  %2318 = vst [vmem:[#allocation23_spill] sm:$0xff] %v1845_v22  ;;  %v1854_v60 = vsub.f32 %v761_v39, %v1828_v10  ;;  %v753_v40 = vand.u32 2147483647, %v1832_v0  ;;  %v1872_v39 = vand.u32 4294901760, %v755_v15  ;;  %v751_v21 = vand.u32 2147483647, %v1845_v22 }
  0x40   :  { %579 = vmatpush.msra.mxu3 %v1670_v4  ;;  %387 = vmatmul.f32.vlgmr.msrb.gmra.mxu2 %v1784_v29  ;;  %2322 = vst [vmem:[#allocation27_spill] sm:$0xff] %v1876_v61 }
  0x41   :  { %325 = vmatmul.f32.vlgmr.msrb.gmra.mxu0 %v1713_v9  ;;  %503 = vmatpush.msra.mxu1 %v1670_v4  ;;  %v1870_v4 = vsub.f32 %v759_v16, %v1841_v30  ;;  %2323 = vst [vmem:[#allocation28_spill] sm:$0xff] %v1878_v47  ;;  %v1890_v16 = vsub.f32 %v757_v33, %v1856_v48  ;;  %v1892_v2 = vand.u32 4294901760, %v753_v40 }
  0x42   :  { %474 = vmatpush.msra.mxu0 %v1708_v58  ;;  %548 = vmatpush.msra.mxu2 %v425_v24  ;;  %v1883_v58 = vsub.f32 %v715_v41, %v1862_v62  ;;  %v1907_v33 = vsub.f32 %v755_v15, %v1872_v39  ;;  %v1909_v41 = vand.u32 4294901760, %v751_v21  ;;  %v762_v24 = vand.u32 2147483647, %v1876_v61  ;;  %2328 = vst [vmem:[#allocation32_spill] sm:$0xff] %v1912_v45 }
  0x43   :  { %581 = vmatpush.msra.mxu3 %v1679_v11  ;;  %354 = vmatmul.f32.vlgmr.msrb.gmra.mxu1 %v1713_v9  ;;  %v2330_v15 = vand.u32 4294901760, %v1773_v51  ;;  %v1930_v61 = vand.u32 4294901760, %v749_v46  ;;  %2332 = vst [vmem:[#allocation34_spill] sm:$0xff] %v1932_v38 }
  0x44   :  { %448 = vmatmul.f32.vlgmr.msrb.gmra.mxu3 %v1713_v9  ;;  %477 = vmatpush.msra.mxu0 %v1711_v1  ;;  %2324 = vst [vmem:[#allocation29_spill] sm:$0xff] %v1883_v58  ;;  %v2327_v1 = vand.u32 4294901760, %v1741_v56 }
  0x45   :  { %505 = vmatpush.msra.mxu1 %v1679_v11  ;;  %552 = vmatpush.msra.mxu2 %v431_v6  ;;  %v1900_v11 = vsub.f32 %v728_v52, %v1878_v47  ;;  %v2331_v52 = vand.u32 4294901760, %v1854_v60  ;;  %v1928_v47 = vsub.f32 %v753_v40, %v1892_v2  ;;  %v2334_v40 = vand.u32 4294901760, %v1870_v4  ;;  %2335 = vst [vmem:[#allocation36_spill] sm:$0xff] %v1951_v36 }
  0x46   :  { %583 = vmatpush.msra.mxu3 %v1689_v14  ;;  %480 = vmatpush.msra.mxu0 %v1741_v56  ;;  %v1918_v56 = vsub.f32 %v726_v49, %v1895_v32  ;;  %v722_v49 = vld [vmem:[#allocation6 + $0xb8] sm:$0xff]  ;;  %v1947_v6 = vsub.f32 %v751_v21, %v1909_v41  ;;  %v1949_v32 = vand.u32 4294901760, %v762_v24  ;;  %v1968_v59 = vsub.f32 %v749_v46, %v1930_v61 }
  0x47   :  { %2326 = vst [vmem:[#allocation31_spill] sm:$0xff] %v1900_v11  ;;  %507 = vmatpush.msra.mxu1 %v1689_v14  ;;  %556 = vmatpush.msra.mxu2 %v2327_v1  ;;  %v747_v14 = vand.u32 2147483647, %v1883_v58  ;;  %v807_v1 = vsub.f32 %v1854_v60, %v2331_v52  ;;  %v2337_v52 = vand.u32 4294901760, %v1890_v16 }
  0x48   :  { %585 = vmatpush.msra.mxu3 %v1691_v18  ;;  %483 = vmatpush.msra.mxu0 %v1773_v51  ;;  %2329 = vst [vmem:[#allocation33_spill] sm:$0xff] %v1918_v56  ;;  %v1938_v51 = vsub.f32 %v724_v23, %v1912_v45  ;;  %v758_v45 = vand.u32 2147483647, %v1918_v56  ;;  %v1987_v62 = vsub.f32 %v762_v24, %v1949_v32  ;;  %v2342_v24 = vand.u32 4294901760, %v1928_v47 }
  0x49   :  { %509 = vmatpush.msra.mxu1 %v1691_v18  ;;  %560 = vmatpush.msra.mxu2 %v2330_v15  ;;  %v760_v18 = vand.u32 2147483647, %v1900_v11  ;;  %v813_v15 = vsub.f32 %v1870_v4, %v2334_v40  ;;  %v720_v11 = vld [vmem:[#allocation6 + $0xa8] sm:$0xff]  ;;  %v1955_v23 = vand.u32 4294901760, %v747_v14  ;;  %v1959_v40 = vsub.f32 %v722_v49, %v1932_v38 }
  0x4a   :  { %587 = vmatpush.msra.mxu3 %v1721_v57  ;;  %562 = vmatmul.f32.vlgmr.msra.gmra.mxu2 %v1713_v9  ;;  %2333 = vst [vmem:[#allocation35_spill] sm:$0xff] %v1938_v51  ;;  %v808_v21 = vand.u32 4294901760, %v807_v1  ;;  %v819_v28 = vsub.f32 %v1890_v16, %v2337_v52  ;;  %v756_v38 = vand.u32 2147483647, %v1938_v51  ;;  %v1976_v56 = vsub.f32 %v720_v11, %v1951_v36  ;;  %v1978_v1 = vld [vmem:[#allocation3 + $0x98] sm:$0xff]  ;;  %v716_v51 = vld [vmem:[#allocation6 + $0x88] sm:$0xff] }
  0x4b   :  { %772 = vmatpush.msrb.mxu0 %v1828_v10  ;;  %867 = vmatpush.msrb.mxu2 %v1854_v60  ;;  %2336 = vst [vmem:[#allocation37_spill] sm:$0xff] %v1959_v40  ;;  %v1972_v49 = vand.u32 4294901760, %v760_v18  ;;  %v814_v46 = vand.u32 4294901760, %v813_v15  ;;  %v2340_v52 = vand.u32 4294901760, %v1907_v33  ;;  %v1992_v11 = vsub.f32 %v747_v14, %v1955_v23  ;;  %v1997_v15 = vld [vmem:[#allocation3 + $0x88] sm:$0xff] }
  0x4c   :  { %511 = vmatpush.msra.mxu1 %v1721_v57  ;;  %589 = vmatpush.msra.mxu3 %v1761_v5  ;;  %2338 = vst [vmem:[#allocation38_spill] sm:$0xff] %v1976_v56  ;;  %v1994_v36 = vand.u32 4294901760, %v758_v45  ;;  %v831_v53 = vsub.f32 %v1928_v47, %v2342_v24  ;;  %v2005_v14 = vsub.f32 %v718_v42, %v1978_v1  ;;  %v2344_v0 = vand.u32 4294901760, %v1947_v6 }
  0x4d   :  { %486 = vmatmul.f32.vlgmr.msra.gmra.mxu0 %v1732_v31  ;;  %591 = vmatmul.f32.vlgmr.msra.gmra.mxu3 %v1713_v9  ;;  %2339 = vst [vmem:[#allocation39_spill] sm:$0xff] %v1978_v1  ;;  %v825_v57 = vsub.f32 %v1907_v33, %v2340_v52  ;;  %v820_v52 = vand.u32 4294901760, %v819_v28  ;;  %v752_v28 = vand.u32 2147483647, %v1976_v56  ;;  %v2021_v22 = vsub.f32 %v716_v51, %v1997_v15 }
  0x4e   :  { %774 = vmatpush.msrb.mxu0 %v1841_v30  ;;  %870 = vmatpush.msrb.mxu2 %v1870_v4  ;;  %2341 = vst [vmem:[#allocation40_spill] sm:$0xff] %v1997_v15  ;;  %v837_v42 = vsub.f32 %v1947_v6, %v2344_v0  ;;  %v832_v0 = vand.u32 4294901760, %v831_v53  ;;  %v750_v1 = vand.u32 2147483647, %v2005_v14 }
  0x4f   :  { %904 = vmatpush.msrb.mxu3 %v1828_v10  ;;  %513 = vmatpush.msra.mxu1 %v1761_v5  ;;  %v754_v5 = vand.u32 2147483647, %v1959_v40  ;;  %2343 = vst [vmem:[#allocation41_spill] sm:$0xff] %v2005_v14  ;;  %v2010_v40 = vsub.f32 %v760_v18, %v1972_v49  ;;  %v826_v24 = vand.u32 4294901760, %v825_v57  ;;  %v2346_v57 = vand.u32 4294901760, %v1968_v59 }
  0x50   :  { %517 = vmatmul.f32.vlgmr.msra.gmra.mxu1 %v1755_v37  ;;  %776 = vmatpush.msrb.mxu0 %v1856_v48  ;;  %2345 = vst [vmem:[#allocation42_spill] sm:$0xff] %v2021_v22  ;;  %v2042_v15 = vand.u32 4294901760, %v752_v28  ;;  %v838_v53 = vand.u32 4294901760, %v837_v42  ;;  %v748_v14 = vand.u32 2147483647, %v2021_v22  ;;  %v2348_v18 = vand.u32 4294901760, %v1992_v11 }
  0x51   :  { %809 = vmatpush.msrb.mxu1 %v808_v21  ;;  %873 = vmatpush.msrb.mxu2 %v1890_v16  ;;  %v2012_v21 = vand.u32 4294901760, %v756_v38  ;;  %v2029_v56 = vand.u32 4294901760, %v754_v5  ;;  %v843_v51 = vsub.f32 %v1968_v59, %v2346_v57  ;;  %v2349_v22 = vand.u32 4294901760, %v2010_v40 }
  0x52   :  { %906 = vmatpush.msrb.mxu3 %v1841_v30  ;;  %778 = vmatpush.msrb.mxu0 %v1872_v39  ;;  %v2068_v34 = vsub.f32 %v752_v28, %v2042_v15 }
  0x53   :  { %815 = vmatpush.msrb.mxu1 %v814_v46  ;;  %876 = vmatpush.msrb.mxu2 %v1907_v33  ;;  %v2027_v46 = vsub.f32 %v758_v45, %v1994_v36  ;;  %v2040_v45 = vsub.f32 %v756_v38, %v2012_v21  ;;  %v849_v38 = vsub.f32 %v1992_v11, %v2348_v18  ;;  %v844_v42 = vand.u32 4294901760, %v843_v51 }
  0x54   :  { %908 = vmatpush.msrb.mxu3 %v1856_v48  ;;  %780 = vmatpush.msrb.mxu0 %v1892_v2  ;;  %v1050_v58 = vsub.f32 %v2010_v40, %v2349_v22  ;;  %v2350_v51 = vand.u32 4294901760, %v1854_v60 }
  0x55   :  { %821 = vmatpush.msrb.mxu1 %v820_v52  ;;  %879 = vmatpush.msrb.mxu2 %v1928_v47  ;;  %v2347_v52 = vand.u32 4294901760, %v1987_v62  ;;  %v850_v63 = vand.u32 4294901760, %v849_v38  ;;  %v2351_v3 = vand.u32 4294901760, %v2027_v46 }
  0x56   :  { %910 = vmatpush.msrb.mxu3 %v1872_v39  ;;  %782 = vmatpush.msrb.mxu0 %v1909_v41  ;;  %v1051_v60 = vand.u32 4294901760, %v1050_v58 }
  0x57   :  { %827 = vmatpush.msrb.mxu1 %v826_v24  ;;  %882 = vmatpush.msrb.mxu2 %v1947_v6  ;;  %v1044_v57 = vsub.f32 %v1987_v62, %v2347_v52  ;;  %v2056_v24 = vsub.f32 %v754_v5, %v2029_v56  ;;  %v2059_v52 = vand.u32 4294901760, %v750_v1  ;;  %v1056_v22 = vsub.f32 %v2027_v46, %v2351_v3 }
  0x58   :  { %912 = vmatpush.msrb.mxu3 %v1892_v2  ;;  %784 = vmatpush.msrb.mxu0 %v1930_v61  ;;  %v1073_v3 = vand.u32 4294901760, %v2068_v34 }
  0x59   :  { %833 = vmatpush.msrb.mxu1 %v832_v0  ;;  %885 = vmatpush.msrb.mxu2 %v1968_v59  ;;  %v1045_v5 = vand.u32 4294901760, %v1044_v57  ;;  %v2071_v0 = vand.u32 4294901760, %v748_v14  ;;  %v1067_v18 = vand.u32 4294901760, %v2056_v24  ;;  %v2082_v28 = vsub.f32 %v750_v1, %v2059_v52 }
  0x5a   :  { %914 = vmatpush.msrb.mxu3 %v1909_v41  ;;  %786 = vmatpush.msrb.mxu0 %v1955_v23  ;;  %v2353_v57 = vand.u32 4294901760, %v2040_v45  ;;  %v2354_v1 = vand.u32 4294901760, %v1890_v16 }
  0x5b   :  { %839 = vmatpush.msrb.mxu1 %v838_v53  ;;  %888 = vmatpush.msrb.mxu2 %v1992_v11  ;;  %v2352_v53 = vand.u32 4294901760, %v1870_v4  ;;  %v1068_v4 = vsub.f32 %v2056_v24, %v1067_v18  ;;  %v1079_v58 = vand.u32 4294901760, %v2082_v28 }
  0x5c   :  { %916 = vmatpush.msrb.mxu3 %v1930_v61  ;;  %937 = vmatpush.msra.mxu0 %v2350_v51  ;;  %v1062_v38 = vsub.f32 %v2040_v45, %v2353_v57  ;;  %v1057_v51 = vand.u32 4294901760, %v1056_v22 }
  0x5d   :  { %1009 = vmatpush.msra.mxu2 %v1949_v32  ;;  %845 = vmatpush.msrb.mxu1 %v844_v42  ;;  %v2093_v42 = vsub.f32 %v748_v14, %v2071_v0  ;;  %v1069_v22 = vand.u32 4294901760, %v1068_v4 }
  0x5e   :  { %918 = vmatpush.msrb.mxu3 %v1955_v23  ;;  %941 = vmatpush.msra.mxu0 %v2352_v53  ;;  %v1063_v14 = vand.u32 4294901760, %v1062_v38 }
  0x5f   :  { %1011 = vmatpush.msra.mxu2 %v1972_v49  ;;  %851 = vmatpush.msrb.mxu1 %v850_v63  ;;  %v1074_v63 = vsub.f32 %v2068_v34, %v1073_v3  ;;  %v1085_v16 = vand.u32 4294901760, %v2093_v42 }
  0x60   :  { %1046 = vmatpush.msra.mxu3 %v1045_v5  ;;  %945 = vmatpush.msra.mxu0 %v2354_v1  ;;  %v2355_v5 = vand.u32 4294901760, %v1907_v33  ;;  %v1080_v33 = vsub.f32 %v2082_v28, %v1079_v58 }
  0x61   :  { %980 = vmatpush.msra.mxu1 %v1828_v10  ;;  %1013 = vmatpush.msra.mxu2 %v1994_v36  ;;  %v2356_v10 = vand.u32 4294901760, %v1928_v47  ;;  %v1075_v53 = vand.u32 4294901760, %v1074_v63  ;;  %v1086_v47 = vsub.f32 %v2093_v42, %v1085_v16 }
  0x62   :  { %1052 = vmatpush.msra.mxu3 %v1051_v60  ;;  %949 = vmatpush.msra.mxu0 %v2355_v5  ;;  %v1081_v60 = vand.u32 4294901760, %v1080_v33 }
  0x63   :  { %982 = vmatpush.msra.mxu1 %v1841_v30  ;;  %1015 = vmatpush.msra.mxu2 %v2012_v21  ;;  %v2357_v30 = vand.u32 4294901760, %v1947_v6  ;;  %v2359_v6 = vand.u32 4294901760, %v1992_v11 }
  0x64   :  { %1058 = vmatpush.msra.mxu3 %v1057_v51  ;;  %953 = vmatpush.msra.mxu0 %v2356_v10 }
  0x65   :  { %984 = vmatpush.msra.mxu1 %v1856_v48  ;;  %1017 = vmatpush.msra.mxu2 %v2029_v56  ;;  %v2358_v48 = vand.u32 4294901760, %v1968_v59  ;;  %v2360_v59 = vand.u32 4294901760, %v1987_v62 }
  0x66   :  { %1064 = vmatpush.msra.mxu3 %v1063_v14  ;;  %957 = vmatpush.msra.mxu0 %v2357_v30 }
  0x67   :  { %986 = vmatpush.msra.mxu1 %v1872_v39  ;;  %1019 = vmatpush.msra.mxu2 %v2042_v15  ;;  %v1087_v39 = vand.u32 4294901760, %v1086_v47 }
  0x68   :  { %1070 = vmatpush.msra.mxu3 %v1069_v22  ;;  %891 = vmatmul.f32.vlgmr.msrb.gmra.mxu2 %v1732_v31 }
  0x69   :  { %961 = vmatpush.msra.mxu0 %v2358_v48  ;;  %988 = vmatpush.msra.mxu1 %v1892_v2  ;;  %v2361_v2 = vand.u32 4294901760, %v2010_v40 }
  0x6a   :  { %1021 = vmatpush.msra.mxu2 %v2059_v52  ;;  %1076 = vmatpush.msra.mxu3 %v1075_v53 }
  0x6b   :  { %792 = vmatmul.f32.vlgmr.msrb.gmra.mxu0 %v1784_v29  ;;  %922 = vmatmul.f32.vlgmr.msrb.gmra.mxu3 %v1755_v37 }
  0x6c   :  { %965 = vmatpush.msra.mxu0 %v2359_v6  ;;  %990 = vmatpush.msra.mxu1 %v1909_v41 }
  0x6d   :  { %1023 = vmatpush.msra.mxu2 %v2071_v0  ;;  %1082 = vmatpush.msra.mxu3 %v1081_v60 }
  0x6e   :  { %1104 = vmatpush.msrb.mxu0 %v1987_v62  ;;  %853 = vmatmul.f32.vlgmr.msrb.gmra.mxu1 %v1713_v9  ;;  %v2362_v62 = vand.u32 4294901760, %v2027_v46 }
  0x6f   :  { %1174 = vmatpush.msrb.mxu2 %v2360_v59  ;;  %1088 = vmatpush.msra.mxu3 %v1087_v39 }
  0x70   :  { %992 = vmatpush.msra.mxu1 %v1930_v61  ;;  %1107 = vmatpush.msrb.mxu0 %v2010_v40  ;;  %v2363_v61 = vmov %v2353_v57 }
  0x71   :  { %1178 = vmatpush.msrb.mxu2 %v2361_v2  ;;  %1217 = vmatpush.msrb.mxu3 %v1949_v32 }
  0x72   :  { %994 = vmatpush.msra.mxu1 %v1955_v23  ;;  %1110 = vmatpush.msrb.mxu0 %v2027_v46 }
  0x73   :  { %1182 = vmatpush.msrb.mxu2 %v2362_v62  ;;  %1219 = vmatpush.msrb.mxu3 %v1972_v49 }
  0x74   :  { %1141 = vmatpush.msrb.mxu1 %v1949_v32  ;;  %1113 = vmatpush.msrb.mxu0 %v2040_v45 }
  0x75   :  { %1186 = vmatpush.msrb.mxu2 %v2363_v61  ;;  %1221 = vmatpush.msrb.mxu3 %v1994_v36 }
  0x76   :  { %1143 = vmatpush.msrb.mxu1 %v1972_v49  ;;  %967 = vmatmul.f32.vlgmr.msra.gmra.mxu0 %v1713_v9 }
  0x77   :  { %1029 = vmatmul.f32.vlgmr.msra.gmra.mxu2 %v1784_v29  ;;  %1090 = vmatmul.f32.vlgmr.msra.gmra.mxu3 %v1713_v9 }
  0x78   :  { %1116 = vmatpush.msrb.mxu0 %v2056_v24  ;;  %1145 = vmatpush.msrb.mxu1 %v1994_v36 }
  0x79   :  { %1190 = vmatpush.msrb.mxu2 %v1067_v18  ;;  %1223 = vmatpush.msrb.mxu3 %v2012_v21 }
  0x7a   :  { %996 = vmatmul.f32.vlgmr.msra.gmra.mxu1 %v1713_v9  ;;  %1119 = vmatpush.msrb.mxu0 %v2068_v34 }
  0x7b   :  { %1147 = vmatpush.msrb.mxu1 %v2012_v21  ;;  %1194 = vmatpush.msrb.mxu2 %v1073_v3 }
  0x7c   :  { %1225 = vmatpush.msrb.mxu3 %v2029_v56  ;;  %1122 = vmatpush.msrb.mxu0 %v2082_v28 }
  0x7d   :  { %1149 = vmatpush.msrb.mxu1 %v2029_v56  ;;  %1198 = vmatpush.msrb.mxu2 %v1079_v58 }
  0x7e   :  { %1227 = vmatpush.msrb.mxu3 %v2042_v15  ;;  %1125 = vmatpush.msrb.mxu0 %v2093_v42 }
  0x7f   :  { %1151 = vmatpush.msrb.mxu1 %v2042_v15  ;;  %1202 = vmatpush.msrb.mxu2 %v1085_v16 }
  0x80   :  { %1229 = vmatpush.msrb.mxu3 %v2059_v52  ;;  %1128 = vmatmul.f32.vlgmr.msrb.gmra.mxu0 %v1732_v31 }
  0x81   :  { %1204 = vmatmul.f32.vlgmr.msrb.gmra.mxu2 %v1713_v9  ;;  %1153 = vmatpush.msrb.mxu1 %v2059_v52 }
  0x82   :  { %1231 = vmatpush.msrb.mxu3 %v2071_v0 }
  0x83   :  { %1233 = vmatmul.f32.vlgmr.msrb.gmra.mxu3 %v1713_v9  ;;  %1155 = vmatpush.msrb.mxu1 %v2071_v0 }
  0x84   :  { %1159 = vmatmul.f32.vlgmr.msrb.gmra.mxu1 %v1755_v37 }
  0xa9   :  { %v212_v29 = vpop.f32.mrf.mxu1 }
  0xad   :  { %v250_v36 = vpop.f32.mrf.mxu2 }
  0xb4   :  { %v151_v32 = vpop.f32.mrf.mxu0 }
  0xb5   :  { %v213_v41 = vadd.f32 %v212_v29, %v151_v32 }
  0xb7   :  { %v251_v40 = vadd.f32 %v250_v36, %v213_v41  ;;  %v2196_v41 = vstv %s2257_s0  ;;  %s1482_s0 = smov [#allocation8]  }
  0xb8   :  { %s1342_s28 = sshll.u32 %s1482_s0, 4  ;;  %s1343_s28 = int_to_ptr.vmem [resolvable:$true] %s1342_s28 }
  0xbb   :  { %v281_v34 = vpop.f32.mrf.mxu3 }
  0xbc   :  { %v282_v11 = vadd.f32 %v281_v34, %v251_v40 }
  0xbe   :  { %v326_v56 = vpop.f32.mrf.mxu0 }
  0xbf   :  { %v327_v45 = vadd.f32 %v326_v56, %v282_v11 }
  0xc0   :  { %v355_v23 = vpop.f32.mrf.mxu1 }
  0xc1   :  { %v356_v18 = vadd.f32 %v355_v23, %v327_v45 }
  0xc3   :  { %v388_v31 = vpop.f32.mrf.mxu2  ;;  %v596_v57 = vsel %vm595_vm1, %v356_v18, 0.0 }
  0xc7   :  { %v449_v49 = vpop.f32.mrf.mxu3 }
  0xc8   :  { %v450_v15 = vadd.f32 %v449_v49, %v388_v31 }
  0xca   :  { %v487_v21 = vpop.f32.mrf.mxu0 }
  0xcb   :  { %v488_v46 = vadd.f32 %v487_v21, %v450_v15 }
  0xcd   :  { %v518_v9 = vpop.f32.mrf.mxu1  ;;  %v563_v24 = vpop.f32.mrf.mxu2 }
  0xce   :  { %v519_v52 = vadd.f32 %v518_v9, %v488_v46 }
  0xd0   :  { %v564_v37 = vadd.f32 %v563_v24, %v519_v52  ;;  %v592_v0 = vpop.f32.mrf.mxu3 }
  0xd2   :  { %v593_v28 = vadd.f32 %v592_v0, %v564_v37 }
  0xd4   :  { %v597_v38 = vsel %vm595_vm1, %v593_v28, 0.0 }
  0xd5   :  { %v598_v3 = vadd.f32 %v597_v38, %v596_v57 }
  0xd7   :  { %599 = vadd.xlane.f32.xlu0 %v598_v3 }
  0xe8   :  { %v793_v42 = vpop.f32.mrf.mxu0 }
  0xeb   :  { %v854_v1 = vpop.f32.mrf.mxu1  ;;  %v892_v4 = vpop.f32.mrf.mxu2 }
  0xec   :  { %v855_v5 = vadd.f32 %v854_v1, %v793_v42 }
  0xee   :  { %v923_v51 = vpop.f32.mrf.mxu3  ;;  %v893_v14 = vadd.f32 %v892_v4, %v855_v5 }
  0xf0   :  { %v924_v33 = vadd.f32 %v923_v51, %v893_v14 }
  0xf3   :  { %v968_v58 = vpop.f32.mrf.mxu0 }
  0xf4   :  { %v969_v47 = vadd.f32 %v968_v58, %v924_v33 }
  0xf7   :  { %v997_v63 = vpop.f32.mrf.mxu1 }
  0xf8   :  { %v2185_v6 = vadd.f32 %v997_v63, %v969_v47 }
  0xfa   :  { %v1030_v16 = vpop.f32.mrf.mxu2  ;;  %v1091_v10 = vpop.f32.mrf.mxu3  ;;  %v1237_v61 = vsel %vm595_vm1, %v2185_v6, 0.0 }
  0xfb   :  { %v1092_v22 = vadd.f32 %v1091_v10, %v1030_v16 }
  0xfd   :  { %v1129_v30 = vpop.f32.mrf.mxu0 }
  0xfe   :  { %v1130_v53 = vadd.f32 %v1129_v30, %v1092_v22 }
 0x101   :  { %v1160_v48 = vpop.f32.mrf.mxu1 }
 0x102   :  { %v1161_v60 = vadd.f32 %v1160_v48, %v1130_v53 }
 0x104   :  { %v1205_v39 = vpop.f32.mrf.mxu2 }
 0x105   :  { %v1206_v59 = vadd.f32 %v1205_v39, %v1161_v60 }
 0x106   :  { %v1234_v2 = vpop.f32.mrf.mxu3 }
 0x107   :  { %v2187_v62 = vadd.f32 %v1234_v2, %v1206_v59  ;;  %v1383_v2 = vld [vmem:[#allocation3] sm:$0xff] }
 0x109   :  { %v1238_v32 = vsel %vm595_vm1, %v2187_v62, 0.0 }
 0x10a   :  { %v1239_v29 = vadd.f32 %v1238_v32, %v1237_v61 }
 0x10c   :  { %1240 = vadd.xlane.f32.xlu0 %v1239_v29  ;;  %v1384_v29 = vld [vmem:[#allocation3 + $0x10] sm:$0xff] }
 0x14a   :  { %v600_v36 = vpop.xlane.xlu0 %599 }
 0x14b   :  { %v602_v34 = vrot.slane %v600_v36, 1 }
 0x14d   :  { %v604_v56 = vadd.f32 %v602_v34, %v356_v18  ;;  %v605_v23 = vadd.f32 %v602_v34, %v593_v28  ;;  %v1385_v34 = vld [vmem:[#allocation3 + $0x20] sm:$0xff] }
 0x14f   :  { %v607_v31 = vadd.f32 %v2196_v41, %v604_v56  ;;  %v608_v40 = vadd.f32 %v2196_v41, %v605_v23  ;;  %v1387_v23 = vld [vmem:[#allocation3 + $0x30] sm:$0xff] }
 0x151   :  { %v1358_v49 = vmul.f32 -1.442695, %v607_v31  ;;  %v1359_v11 = vmul.f32 -1.442695, %v608_v40 }
 0x153   :  { %1367 = vpow2.f32 %v1358_v49 }
 0x154   :  { %1369 = vpow2.f32 %v1359_v11  ;;  %v1390_v11 = vld [vmem:[#allocation3 + $0x48] sm:$0xff] }
 0x159   :  { %v1368_v15 = vpop.eup %1367 }
 0x15a   :  { %v1370_v21 = vpop.eup %1369  ;;  %v615_v46 = vadd.f32 1.0, %v1368_v15 }
 0x15b   :  { %v616_v45 = vadd.f32 1.0, %v1370_v21  ;;  %v2364_v21 = vld [vmem:[#allocation12_spill] sm:$0xff] }
 0x15c   :  { %1371 = vrcp.f32 %v615_v46  ;;  %v628_v0 = vand.u32 2147483648, %v615_v46  ;;  %v626_v38 = vand.u32 2147483647, %v615_v46  ;;  %vm622_vm4 = vweird.f32 %v615_v46 }
 0x15d   :  { %1373 = vrcp.f32 %v616_v45  ;;  %v643_v3 = vand.u32 2147483648, %v616_v45  ;;  %v641_v1 = vand.u32 2147483647, %v616_v45  ;;  %vm637_vm6 = vweird.f32 %v616_v45 }
 0x15e   :  { %v629_v4 = vor.u32 1.1754944e-38, %v628_v0  ;;  %vm627_vm7 = vcmp.eq.f32.partialorder %v626_v38, 8.507059e+37  ;;  %v1396_v38 = vld [vmem:[#allocation3 + $0x78] sm:$0xff] }
 0x15f   :  { %v644_v14 = vor.u32 1.1754944e-38, %v643_v3  ;;  %vm642_vm9 = vcmp.eq.f32.partialorder %v641_v1, 8.507059e+37 }
 0x162   :  { %v1372_v9 = vpop.eup %1371 }
 0x163   :  { %v1374_v24 = vpop.eup %1373  ;;  %v618_v52 = vmul.f32 %v1372_v9, %v615_v46  ;;  %vm623_vm2 = vweird.f32 %v1372_v9  ;;  %v1391_v46 = vld [vmem:[#allocation3 + $0x50] sm:$0xff] }
 0x164   :  { %v633_v37 = vmul.f32 %v1374_v24, %v616_v45  ;;  %vm638_vm3 = vweird.f32 %v1374_v24  ;;  %vm624_vm5 = vmor %vm622_vm4, %vm623_vm2 }
 0x165   :  { %v619_v18 = vsub.f32 1.0, %v618_v52  ;;  %vm639_vm8 = vmor %vm637_vm6, %vm638_vm3 }
 0x166   :  { %v634_v28 = vsub.f32 1.0, %v633_v37  ;;  %v1393_v37 = vld [vmem:[#allocation3 + $0x60] sm:$0xff] }
 0x167   :  { %v620_v57 = vmul.f32 %v1372_v9, %v619_v18  ;;  %v1394_v18 = vld [vmem:[#allocation3 + $0x68] sm:$0xff] }
 0x168   :  { %v635_v42 = vmul.f32 %v1374_v24, %v634_v28 }
 0x169   :  { %v621_v51 = vadd.f32 %v1372_v9, %v620_v57 }
 0x16a   :  { %v636_v58 = vadd.f32 %v1374_v24, %v635_v42 }
 0x16b   :  { %v625_v5 = vsel %vm624_vm5, %v1372_v9, %v621_v51  ;;  %v2365_v9 = vld [vmem:[#allocation13_spill] sm:$0xff] }
 0x16c   :  { %v630_v63 = vsel %vm627_vm7, %v629_v4, %v625_v5  ;;  %v640_v16 = vsel %vm639_vm8, %v1374_v24, %v636_v58  ;;  %v1392_v24 = vld [vmem:[#allocation3 + $0x58] sm:$0xff] }
 0x16d   :  { %v645_v10 = vsel %vm642_vm9, %v644_v14, %v640_v16  ;;  %v647_v22 = vperm.slane %v630_v63, 0 }
 0x16e   :  { %v648_v33 = vperm.slane %v645_v10, 0 }
 0x16f   :  { %v649_v30 = vmul.f32 %v647_v22, %v1554_v35  ;;  %v651_v53 = vmul.f32 %v647_v22, %v1538_v25  ;;  %v653_v60 = vmul.f32 %v647_v22, %v1533_v20  ;;  %v655_v59 = vmul.f32 %v647_v22, %v1531_v19 }
 0x170   :  { %v650_v47 = vmul.f32 %v648_v33, %v1738_v44  ;;  %v652_v48 = vmul.f32 %v648_v33, %v1682_v12  ;;  %v654_v39 = vmul.f32 %v648_v33, %v1653_v54  ;;  %v656_v35 = vmul.f32 %v648_v33, %v1651_v50  ;;  %v1386_v54 = vld [vmem:[#allocation3 + $0x28] sm:$0xff]  ;;  %v1388_v50 = vld [vmem:[#allocation3 + $0x38] sm:$0xff] }
 0x171   :  { %v665_v61 = vadd.f32 %v1383_v2, %v649_v30  ;;  %v667_v36 = vadd.f32 %v1384_v29, %v651_v53  ;;  %v657_v44 = vmul.f32 %v647_v22, %v1527_v13  ;;  %v669_v12 = vadd.f32 %v1385_v34, %v653_v60 }
 0x172   :  { %v666_v32 = vadd.f32 %v650_v47, %v1715_v26  ;;  %v668_v25 = vadd.f32 %v652_v48, %v1655_v55  ;;  %v658_v20 = vmul.f32 %v648_v33, %v1641_v43  ;;  %v670_v56 = vadd.f32 %v1386_v54, %v654_v39  ;;  %v1389_v55 = vld [vmem:[#allocation3 + $0x40] sm:$0xff]  ;;  %v2366_v54 = vld [vmem:[#allocation29_spill] sm:$0xff] }
 0x173   :  { %681 = vst [vmem:[#allocation8] sm:$0xff] %v665_v61  ;;  %v659_v19 = vmul.f32 %v647_v22, %v1524_v8  ;;  %v671_v26 = vadd.f32 %v1387_v23, %v655_v59  ;;  %v660_v31 = vmul.f32 %v648_v33, %v1632_v27  ;;  %v672_v40 = vadd.f32 %v1388_v50, %v656_v35  ;;  %v2369_v50 = vld [vmem:[#allocation41_spill] sm:$0xff] }
 0x174   :  { %682 = vst [vmem:[#allocation8 + $0x8] sm:$0xff] %v666_v32  ;;  %v661_v13 = vmul.f32 %v647_v22, %v1522_v7  ;;  %v673_v49 = vadd.f32 %v1389_v55, %v657_v44  ;;  %v662_v43 = vmul.f32 %v648_v33, %v1626_v17  ;;  %v674_v15 = vadd.f32 %v1390_v11, %v658_v20  ;;  %v1395_v17 = vld [vmem:[#allocation3 + $0x70] sm:$0xff]  ;;  %v2372_v11 = vld [vmem:[#allocation21_spill] sm:$0xff] }
 0x175   :  { %683 = vst [vmem:[#allocation8 + $0x10] sm:$0xff] %v667_v36  ;;  %v663_v8 = vmul.f32 %v647_v22, %v2364_v21  ;;  %v675_v45 = vadd.f32 %v1391_v46, %v659_v19  ;;  %v664_v27 = vmul.f32 %v648_v33, %v2365_v9  ;;  %v676_v52 = vadd.f32 %v1392_v24, %v660_v31  ;;  %v2367_v19 = vld [vmem:[#allocation25_spill] sm:$0xff]  ;;  %v2373_v21 = vld [vmem:[#allocation26_spill] sm:$0xff]  ;;  %v2374_v46 = vld [vmem:[#allocation40_spill] sm:$0xff] }
 0x176   :  { %684 = vst [vmem:[#allocation8 + $0x18] sm:$0xff] %v668_v25  ;;  %v677_v7 = vadd.f32 %v1393_v37, %v661_v13  ;;  %v678_v0 = vadd.f32 %v1394_v18, %v662_v43  ;;  %v2370_v13 = vld [vmem:[#allocation23_spill] sm:$0xff]  ;;  %v2375_v9 = vld [vmem:[#allocation22_spill] sm:$0xff]  ;;  %v2376_v24 = vld [vmem:[#allocation37_spill] sm:$0xff] }
 0x177   :  { %685 = vst [vmem:[#allocation8 + $0x20] sm:$0xff] %v669_v12  ;;  %v679_v28 = vadd.f32 %v1395_v17, %v663_v8  ;;  %v680_v3 = vadd.f32 %v1396_v38, %v664_v27  ;;  %v2377_v37 = vld [vmem:[#allocation39_spill] sm:$0xff]  ;;  %v2379_v17 = vld [vmem:[#allocation20_spill] sm:$0xff] }
 0x178   :  { %686 = vst [vmem:[#allocation8 + $0x28] sm:$0xff] %v670_v56  ;;  %v2378_v18 = vld [vmem:[#allocation19_spill] sm:$0xff] }
 0x179   :  { %687 = vst [vmem:[#allocation8 + $0x30] sm:$0xff] %v671_v26  ;;  %v2368_v26 = vld [vmem:[#allocation42_spill] sm:$0xff] }
 0x17a   :  { %688 = vst [vmem:[#allocation8 + $0x38] sm:$0xff] %v672_v40 }
 0x17b   :  { %689 = vst [vmem:[#allocation8 + $0x40] sm:$0xff] %v673_v49  ;;  %v2371_v49 = vld [vmem:[#allocation38_spill] sm:$0xff] }
 0x17c   :  { %690 = vst [vmem:[#allocation8 + $0x48] sm:$0xff] %v674_v15 }
 0x17d   :  { %691 = vst [vmem:[#allocation8 + $0x50] sm:$0xff] %v675_v45 }
 0x17e   :  { %692 = vst [vmem:[#allocation8 + $0x58] sm:$0xff] %v676_v52 }
 0x17f   :  { %v1241_v57 = vpop.xlane.xlu0 %1240  ;;  %693 = vst [vmem:[#allocation8 + $0x60] sm:$0xff] %v677_v7 }
 0x180   :  { %v1243_v42 = vrot.slane %v1241_v57, 1  ;;  %694 = vst [vmem:[#allocation8 + $0x68] sm:$0xff] %v678_v0  ;;  %v2380_v57 = vld [vmem:[#allocation35_spill] sm:$0xff] }
 0x181   :  { %695 = vst [vmem:[#allocation8 + $0x70] sm:$0xff] %v679_v28 }
 0x182   :  { %v1245_v1 = vadd.f32 %v1243_v42, %v2185_v6  ;;  %v1246_v51 = vadd.f32 %v1243_v42, %v2187_v62  ;;  %696 = vst [vmem:[#allocation8 + $0x78] sm:$0xff] %v680_v3  ;;  %v2381_v3 = vld [vmem:[#allocation36_spill] sm:$0xff] }
 0x184   :  { %v1247_v4 = vadd.f32 %v1245_v1, %v2196_v41  ;;  %v1248_v58 = vadd.f32 %v1246_v51, %v2196_v41  ;;  %v2382_v1 = vld [vmem:[#allocation17_spill] sm:$0xff] }
 0x186   :  { %v1360_v5 = vmul.f32 -1.442695, %v1247_v4  ;;  %v1361_v14 = vmul.f32 -1.442695, %v1248_v58  ;;  %v2383_v4 = vld [vmem:[#allocation18_spill] sm:$0xff] }
 0x188   :  { %1375 = vpow2.f32 %v1360_v5  ;;  %v2384_v5 = vld [vmem:[#allocation33_spill] sm:$0xff] }
 0x189   :  { %1377 = vpow2.f32 %v1361_v14 }
 0x18e   :  { %v1376_v63 = vpop.eup %1375 }
 0x18f   :  { %v1378_v16 = vpop.eup %1377  ;;  %v1255_v10 = vadd.f32 1.0, %v1376_v63  ;;  %v2385_v63 = vld [vmem:[#allocation34_spill] sm:$0xff] }
 0x190   :  { %v1256_v22 = vadd.f32 1.0, %v1378_v16 }
 0x191   :  { %1379 = vrcp.f32 %v1255_v10  ;;  %v1268_v47 = vand.u32 2147483648, %v1255_v10  ;;  %v1266_v41 = vand.u32 2147483647, %v1255_v10  ;;  %vm1262_vm12 = vweird.f32 %v1255_v10 }
 0x192   :  { %1381 = vrcp.f32 %v1256_v22  ;;  %v1283_v39 = vand.u32 2147483648, %v1256_v22  ;;  %v1281_v2 = vand.u32 2147483647, %v1256_v22  ;;  %vm1277_vm14 = vweird.f32 %v1256_v22 }
 0x193   :  { %v1269_v32 = vor.u32 1.1754944e-38, %v1268_v47  ;;  %vm1267_vm15 = vcmp.eq.f32.partialorder %v1266_v41, 8.507059e+37  ;;  %v1397_v41 = vld [vmem:[#allocation3 + $0xd0] sm:$0xff] }
 0x194   :  { %v1284_v35 = vor.u32 1.1754944e-38, %v1283_v39  ;;  %vm1282_vm1 = vcmp.eq.f32.partialorder %v1281_v2, 8.507059e+37 }
 0x197   :  { %v1380_v33 = vpop.eup %1379 }
 0x198   :  { %v1382_v6 = vpop.eup %1381  ;;  %v1258_v30 = vmul.f32 %v1380_v33, %v1255_v10  ;;  %vm1263_vm10 = vweird.f32 %v1380_v33  ;;  %v2386_v10 = vld [vmem:[#allocation15_spill] sm:$0xff] }
 0x199   :  { %v1273_v62 = vmul.f32 %v1382_v6, %v1256_v22  ;;  %vm1278_vm11 = vweird.f32 %v1382_v6  ;;  %vm1264_vm13 = vmor %vm1262_vm12, %vm1263_vm10 }
 0x19a   :  { %v1259_v53 = vsub.f32 1.0, %v1258_v30  ;;  %vm1279_vm0 = vmor %vm1277_vm14, %vm1278_vm11  ;;  %v2388_v30 = vld [vmem:[#allocation31_spill] sm:$0xff] }
 0x19b   :  { %v1274_v48 = vsub.f32 1.0, %v1273_v62 }
 0x19c   :  { %v1260_v60 = vmul.f32 %v1380_v33, %v1259_v53  ;;  %v2389_v53 = vld [vmem:[#allocation32_spill] sm:$0xff] }
 0x19d   :  { %v1275_v59 = vmul.f32 %v1382_v6, %v1274_v48  ;;  %v2390_v48 = vld [vmem:[#allocation14_spill] sm:$0xff] }
 0x19e   :  { %v1261_v61 = vadd.f32 %v1380_v33, %v1260_v60 }
 0x19f   :  { %v1276_v29 = vadd.f32 %v1382_v6, %v1275_v59  ;;  %v2391_v59 = vld [vmem:[#allocation27_spill] sm:$0xff] }
 0x1a0   :  { %v1265_v36 = vsel %vm1264_vm13, %v1380_v33, %v1261_v61  ;;  %v2387_v33 = vld [vmem:[#allocation16_spill] sm:$0xff]  ;;  %v2392_v61 = vld [vmem:[#allocation30_spill] sm:$0xff] }
 0x1a1   :  { %v1270_v25 = vsel %vm1267_vm15, %v1269_v32, %v1265_v36  ;;  %v1280_v44 = vsel %vm1279_vm0, %v1382_v6, %v1276_v29  ;;  %v1398_v29 = vld [vmem:[#allocation3 + $0xe0] sm:$0xff] }
 0x1a2   :  { %v1285_v34 = vsel %vm1282_vm1, %v1284_v35, %v1280_v44  ;;  %v1287_v12 = vperm.slane %v1270_v25, 0  ;;  %v2393_v35 = vld [vmem:[#allocation28_spill] sm:$0xff]  ;;  %v1399_v44 = vld [vmem:[#allocation3 + $0xf0] sm:$0xff] }
 0x1a3   :  { %v1288_v20 = vperm.slane %v1285_v34, 0 }
 0x1a4   :  { %v1289_v56 = vmul.f32 %v1287_v12, %v2366_v54  ;;  %v1291_v23 = vmul.f32 %v1287_v12, %v2367_v19  ;;  %v1293_v55 = vmul.f32 %v1287_v12, %v2370_v13  ;;  %v1295_v15 = vmul.f32 %v1287_v12, %v2372_v11 }
 0x1a5   :  { %v1290_v31 = vmul.f32 %v1288_v20, %v2368_v26  ;;  %v1292_v40 = vmul.f32 %v1288_v20, %v2369_v50  ;;  %v1294_v43 = vmul.f32 %v1288_v20, %v2371_v49  ;;  %v1296_v52 = vmul.f32 %v1288_v20, %v2376_v24 }
 0x1a6   :  { %v1305_v8 = vadd.f32 %v1289_v56, %v2373_v21  ;;  %v1307_v27 = vadd.f32 %v1291_v23, %v2375_v9  ;;  %v1297_v0 = vmul.f32 %v1287_v12, %v2378_v18  ;;  %v1309_v28 = vadd.f32 %v1293_v55, %v2379_v17 }
 0x1a7   :  { %v1306_v45 = vadd.f32 %v1290_v31, %v2374_v46  ;;  %v1308_v7 = vadd.f32 %v1292_v40, %v2377_v37  ;;  %v1298_v38 = vmul.f32 %v1288_v20, %v2380_v57  ;;  %v1310_v42 = vadd.f32 %v1294_v43, %v2381_v3 }
 0x1a8   :  { %1322 = vst [vmem:[#allocation8 + $0x80] sm:$0xff] %v1305_v8  ;;  %v1299_v51 = vmul.f32 %v1287_v12, %v2382_v1  ;;  %v1311_v58 = vadd.f32 %v1295_v15, %v2383_v4  ;;  %v1300_v14 = vmul.f32 %v1288_v20, %v2384_v5  ;;  %v1312_v16 = vadd.f32 %v1296_v52, %v2385_v63 }
 0x1a9   :  { %1323 = vst [vmem:[#allocation8 + $0x88] sm:$0xff] %v1306_v45  ;;  %v1301_v22 = vmul.f32 %v1287_v12, %v2386_v10  ;;  %v1313_v6 = vadd.f32 %v1297_v0, %v2387_v33  ;;  %v1302_v62 = vmul.f32 %v1288_v20, %v2388_v30  ;;  %v1314_v47 = vadd.f32 %v1298_v38, %v2389_v53 }
 0x1aa   :  { %1324 = vst [vmem:[#allocation8 + $0x90] sm:$0xff] %v1307_v27  ;;  %v1303_v60 = vmul.f32 %v1287_v12, %v2390_v48  ;;  %v1315_v39 = vadd.f32 %v1397_v41, %v1299_v51  ;;  %v1304_v2 = vmul.f32 %v1288_v20, %v2391_v59  ;;  %v1316_v32 = vadd.f32 %v1300_v14, %v2392_v61  ;;  %v2394_v12 = vld [vmem:[#allocation24_spill] sm:$0xff] }
 0x1ab   :  { %1325 = vst [vmem:[#allocation8 + $0x98] sm:$0xff] %v1308_v7  ;;  %v1317_v36 = vadd.f32 %v1398_v29, %v1301_v22  ;;  %v1318_v25 = vadd.f32 %v1302_v62, %v2393_v35 }
 0x1ac   :  { %1326 = vst [vmem:[#allocation8 + $0xa0] sm:$0xff] %v1309_v28  ;;  %v1319_v34 = vadd.f32 %v1399_v44, %v1303_v60  ;;  %v1320_v20 = vadd.f32 %v1304_v2, %v2394_v12 }
 0x1ad   :  { %1327 = vst [vmem:[#allocation8 + $0xa8] sm:$0xff] %v1310_v42 }
 0x1ae   :  { %1328 = vst [vmem:[#allocation8 + $0xb0] sm:$0xff] %v1311_v58 }
 0x1af   :  { %1329 = vst [vmem:[#allocation8 + $0xb8] sm:$0xff] %v1312_v16 }
 0x1b0   :  { %1330 = vst [vmem:[#allocation8 + $0xc0] sm:$0xff] %v1313_v6 }
 0x1b1   :  { %1331 = vst [vmem:[#allocation8 + $0xc8] sm:$0xff] %v1314_v47 }
 0x1b2   :  { %1332 = vst [vmem:[#allocation8 + $0xd0] sm:$0xff] %v1315_v39 }
 0x1b3   :  { %1333 = vst [vmem:[#allocation8 + $0xd8] sm:$0xff] %v1316_v32 }
 0x1b4   :  { %1334 = vst [vmem:[#allocation8 + $0xe0] sm:$0xff] %v1317_v36 }
 0x1b5   :  { %1335 = vst [vmem:[#allocation8 + $0xe8] sm:$0xff] %v1318_v25 }
 0x1b6   :  { %1336 = vst [vmem:[#allocation8 + $0xf0] sm:$0xff] %v1319_v34 }
 0x1b7   :  { %1337 = vst [vmem:[#allocation8 + $0xf8] sm:$0xff] %v1320_v20 }
 0x1b8   :  { %1350 = dma.vmem_to_hbm [thread:$0]  %s1343_s28, 4096, %s1345_s5, [#allocation5], %s1479_s23, %s1479_s23, %s1480_s24  }
 0x1b9   :  { %1476 = dma.done.wait [#allocation5], 4096  }
 0x1ba   :  { %1477 = vsyncadd [#allocation5], 4294963200 }
 0x1bb   :  { %1355 = vsyncpa [#allocation4], 1 }
 0x1bc   :  { %1356 = vsyncpa [#allocation7], 1 }
 0x1bd   :  { %1357 = vsyncpa [#allocation5], 1 }

</bundles_post_ra>
